<compile_context>
chip_gen: v7x
topology: tpu7x:2x2x1
jax: 0.10.0
libtpu: 0.0.40
codegen_flags: <defaults>
</compile_context>

<pallas_src>
import functools

import jax
import jax.numpy as jnp
from jax import lax
from jax.experimental import pallas as pl
from jax.experimental.pallas import tpu as pltpu


# ----------------------------------------------------------------------------
# Tiling / VMEM helpers
# ----------------------------------------------------------------------------
def _round_up(x, m):
    return ((x + m - 1) // m) * m


def _pick_tile(total, target):
    """Largest T with total % T == 0 and (T == total or T % 128 == 0), T <= target."""
    if total <= target:
        return total
    best = None
    t = 128
    while t <= target:
        if total % t == 0:
            best = t
        t += 128
    return best if best is not None else total


def _vmem_capacity_bytes():
    try:
        info = pltpu.get_tpu_info()
        cap = getattr(info, "vmem_capacity_bytes", None)
        if cap:
            return int(cap)
    except Exception:
        pass
    return 64 * 1024 * 1024   # conservative fallback (v7x-sized VMEM)


def _vmem_limit_bytes(cap):
    # Leave headroom for Mosaic internal scratch / double buffering.
    return min((cap * 3) // 4, 96 * 1024 * 1024)


def _ball_query_tiles(M, Np, budget_bytes):
    """Pick (TM, NT) so ~8 live (TM, NT) f32 temporaries fit the VMEM budget."""
    NT = _pick_tile(Np, 1024)
    tm_target = max(128, budget_bytes // (8 * NT * 4))
    TM = _pick_tile(M, min(tm_target, 512))
    return TM, NT


def _mlp_tile(M, K, Cin, widths, budget_bytes):
    """Pick TM from a per-M-row byte estimate (grouped input + activations)."""
    cin_pad = _round_up(max(Cin, 1), 128)     # bf16 lane padding of the input tile
    cmax = max(widths)
    cout = widths[-1]
    per_m = K * (8 * cin_pad + 6 * cmax) + 8 * cout
    tm_target = max(128, budget_bytes // max(per_m, 1))
    return _pick_tile(M, min(tm_target, 512))


# ----------------------------------------------------------------------------
# Pallas kernel 1: ball query (radius neighbourhood search, mmcv semantics)
# ----------------------------------------------------------------------------
def _ball_query_kernel(new_ref, pts_ref, idx_ref, cnt_scr, acc_scr, *, radius2, K):
    n = pl.program_id(2)

    @pl.when(n == 0)
    def _():
        cnt_scr[...] = jnp.zeros_like(cnt_scr)
        acc_scr[...] = jnp.zeros_like(acc_scr)

    q = new_ref[0]                         # (TM, 3) f32
    p = pts_ref[0]                         # (3, NT) f32, lane-dense
    TM = q.shape[0]
    NT = p.shape[1]

    # d2 = (q - p)^2 summed over coords: three broadcast VPU passes (no MXU,
    # no cancellation near the radius boundary).
    dx = q[:, 0:1] - p[0:1, :]
    dy = q[:, 1:2] - p[1:2, :]
    dz = q[:, 2:3] - p[2:3, :]
    d2 = dx * dx + dy * dy + dz * dz       # (TM, NT)
    maskf = (d2 < radius2).astype(jnp.float32)

    niota = lax.broadcasted_iota(jnp.int32, (TM, NT), 1)
    gidx = (niota + n * NT).astype(jnp.float32)     # global point index
    midx = maskf * gidx                              # 0 at invalid columns

    # Inclusive prefix count of valid neighbours within this chunk
    # (Hillis-Steele roll-add scan; NT is bounded by the N tiling).
    cum = maskf
    shift = 1
    while shift < NT:
        rolled = pltpu.roll(cum, shift, axis=1)
        cum = cum + jnp.where(niota >= shift, rolled, 0.0)
        shift *= 2
    carry = cnt_scr[...]                             # (TM, 1) count from prior chunks
    cum = cum + carry                                # global inclusive rank
    cnt_scr[...] = carry + jnp.sum(maskf, axis=1, keepdims=True)

    # The (k+1)-th valid neighbour is the unique valid column with cum == k+1;
    # invalid columns have midx == 0, so a single equality + masked sum recovers
    # its global index exactly (counts/indices are integer-valued f32, N < 2^24).
    cols = []
    for k in range(K):
        sel = jnp.where(cum == float(k + 1), midx, 0.0)
        cols.append(jnp.sum(sel, axis=1, keepdims=True))        # (TM, 1)
    acc_scr[...] = acc_scr[...] + jnp.concatenate(cols, axis=1)  # (TM, K)

    @pl.when(n == pl.num_programs(2) - 1)
    def _():
        cnt = cnt_scr[...]                           # (TM, 1) total valid count
        acc = acc_scr[...]                           # (TM, K) exact integer values
        first = acc[:, 0:1]                          # first valid index (0 if empty)
        kiota = lax.broadcasted_iota(jnp.int32, acc.shape, 1).astype(jnp.float32)
        idx = jnp.where(cnt > kiota + 0.5, acc, first)
        idx_ref[0] = jnp.transpose(idx).astype(jnp.int32)        # (K, TM) lane-dense


def ball_query(new_xyz, points_t, radius, K, *, tile_m, tile_n, vmem_limit):
    """new_xyz (B, M, 3) f32, points_t (B, 3, Np) f32 -> idx (B, K, M) int32."""
    B, M, _ = new_xyz.shape
    Np = points_t.shape[2]
    assert Np < (1 << 24), "f32 rank/index arithmetic requires N < 2^24"
    NT = _pick_tile(Np, tile_n)
    TM = _pick_tile(M, tile_m)

    kernel = functools.partial(_ball_query_kernel,
                               radius2=float(radius) ** 2, K=int(K))
    return pl.pallas_call(
        kernel,
        out_shape=jax.ShapeDtypeStruct((B, K, M), jnp.int32),
        grid=(B, M // TM, Np // NT),
        in_specs=[
            pl.BlockSpec((1, TM, 3), lambda b, m, n: (b, m, 0)),
            pl.BlockSpec((1, 3, NT), lambda b, m, n: (b, 0, n)),
        ],
        out_specs=pl.BlockSpec((1, K, TM), lambda b, m, n: (b, 0, m)),
        scratch_shapes=[
            pltpu.VMEM((TM, 1), jnp.float32),    # running valid-neighbour count
            pltpu.VMEM((TM, K), jnp.float32),    # accumulated per-rank indices
        ],
        compiler_params=pltpu.CompilerParams(
            dimension_semantics=("parallel", "parallel", "arbitrary"),
            vmem_limit_bytes=vmem_limit),
    )(new_xyz, points_t)


# ----------------------------------------------------------------------------
# Pallas kernel 2: fused shared-MLP (1x1 conv, folded BN, bf16 MXU) + pool(K)
# ----------------------------------------------------------------------------
def _mlp_pool_kernel(g_ref, *rest, num_layers, K, pool_mod, relu_after_pool):
    out_ref = rest[-1]
    params = rest[:-1]

    # (TM*K, Cin) bf16: recentered/normalized xyz channels | feature channels.
    x = g_ref[0]
    TM = x.shape[0] // K

    for l in range(num_layers):
        w = params[2 * l][...]            # (C_l, C_{l+1}) bf16, BN scale folded
        b = params[2 * l + 1][...]        # (1, C_{l+1}) f32 folded BN bias
        y = jnp.dot(x, w, preferred_element_type=jnp.float32) + b
        last = l == num_layers - 1
        if not (last and relu_after_pool):
            y = jnp.maximum(y, 0.0)
        # Inter-layer activations kept in bf16 (halves VMEM temporaries / vld
        # traffic feeding the next matmul); the pre-pool activation stays f32.
        x = y if last else y.astype(jnp.bfloat16)

    cf = x.shape[-1]
    x = x.reshape(TM, K, cf)              # K is a multiple of 8 -> cheap reshape
    if pool_mod == "max":
        pooled = jnp.max(x, axis=1)       # (TM, Cout)
    else:  # 'avg'
        pooled = jnp.sum(x, axis=1) * (1.0 / K)
    if relu_after_pool:
        pooled = jnp.maximum(pooled, 0.0)  # ReLU commutes with max-pool
    # Lane-dense store: (Cout, TM) so the last (lane) dim is M.
    out_ref[0] = jnp.transpose(pooled).astype(out_ref.dtype)


def mlp_pool(grouped, layers, *, M, K, pool_mod, tile_m, vmem_limit,
             out_dtype=jnp.float32):
    """grouped (B, M*K, Cin) bf16 -> pooled (B, Cout, M)."""
    B, MK, Cin = grouped.shape
    assert MK == M * K
    Cout = layers[-1][0].shape[1]
    TM = _pick_tile(M, tile_m)

    inputs = [grouped]
    in_specs = [pl.BlockSpec((1, TM * K, Cin), lambda b, m: (b, m, 0))]
    for (w, b) in layers:
        inputs += [w, b]
        in_specs += [pl.BlockSpec(w.shape, lambda b, m: (0, 0)),
                     pl.BlockSpec(b.shape, lambda b, m: (0, 0))]

    kernel = functools.partial(
        _mlp_pool_kernel, num_layers=len(layers), K=int(K), pool_mod=pool_mod,
        relu_after_pool=(pool_mod == "max"))

    # NOTE: output stays f32; switch out_dtype to bf16 for a small extra win on
    # v5e if the downstream consumer tolerates it.
    return pl.pallas_call(
        kernel,
        out_shape=jax.ShapeDtypeStruct((B, Cout, M), out_dtype),
        grid=(B, M // TM),
        in_specs=in_specs,
        out_specs=pl.BlockSpec((1, Cout, TM), lambda b, m: (b, 0, m)),
        compiler_params=pltpu.CompilerParams(
            dimension_semantics=("parallel", "parallel"),
            vmem_limit_bytes=vmem_limit),
    )(*inputs)


# ----------------------------------------------------------------------------
# Plain-JAX glue: D-FPS sampling and index gathers
# ----------------------------------------------------------------------------
def _furthest_point_sample(points_xyz, num_point):
    """D-FPS, mmcv semantics (start at index 0). (B, N, 3) -> (B, num_point)."""
    # TODO(synk): F-FPS / FS sampling modes are not implemented (D-FPS only).
    B, N, _ = points_xyz.shape

    def single(pts):
        def body(s, carry):
            dist, last, idxs = carry
            cur = pts[last]
            d = jnp.sum((pts - cur[None, :]) ** 2, axis=-1)
            dist = jnp.minimum(dist, d)
            nxt = jnp.argmax(dist).astype(jnp.int32)
            idxs = idxs.at[s].set(nxt)
            return dist, nxt, idxs

        dist0 = jnp.full((N,), 1e10, jnp.float32)
        idxs0 = jnp.zeros((num_point,), jnp.int32)
        _, _, idxs = lax.fori_loop(1, num_point, body, (dist0, jnp.int32(0), idxs0))
        return idxs

    return jax.vmap(single)(points_xyz)


def _gather_along_points(data_nlc, idx):
    """data (B, N, D), idx (B, ...) -> gathered (B, ..., D)."""
    B = data_nlc.shape[0]
    D = data_nlc.shape[-1]
    flat = idx.reshape(B, -1, 1).astype(jnp.int32)
    flat = jnp.broadcast_to(flat, (B, flat.shape[1], D))
    g = jnp.take_along_axis(data_nlc, flat, axis=1)
    return g.reshape(idx.shape + (D,))


# ----------------------------------------------------------------------------
# The module
# ----------------------------------------------------------------------------
class BasePointSAModulePallas:
    def __init__(self, num_point, radii, sample_nums, mlp_channels, key,
                 use_xyz=True, pool_mod="max", normalize_xyz=False):
        assert len(radii) == len(sample_nums) == len(mlp_channels)
        assert pool_mod in ("max", "avg")
        self.num_point = [num_point] if isinstance(num_point, int) else list(num_point)
        self.radii = list(radii)
        self.sample_nums = list(sample_nums)
        self.use_xyz = use_xyz
        self.pool_mod = pool_mod
        self.normalize_xyz = normalize_xyz

        # Deterministic synthetic parameters: 1x1 Conv2d weights (no bias) with
        # eval-mode BatchNorm2d folded in.  The BN scale is folded into the bf16
        # weight matrix; only a per-channel f32 bias survives.
        self.params = []
        self.out_channels = []
        self.mlp_widths = []
        for chans in mlp_channels:
            chans = list(chans)
            if use_xyz:
                chans = [chans[0] + 3] + chans[1:]
            layers = []
            for l in range(len(chans) - 1):
                key, kw, kg, kb = jax.random.split(key, 4)
                w = jax.random.normal(kw, (chans[l], chans[l + 1]), jnp.float32) * 0.1
                gamma = 1.0 + 0.1 * jax.random.normal(kg, (chans[l + 1],), jnp.float32)
                beta = 0.1 * jax.random.normal(kb, (chans[l + 1],), jnp.float32)
                running_mean = jnp.zeros((chans[l + 1],), jnp.float32)
                running_var = jnp.ones((chans[l + 1],), jnp.float32)
                scale = gamma * lax.rsqrt(running_var + 1e-5)
                bias = beta - running_mean * scale
                layers.append(((w * scale[None, :]).astype(jnp.bfloat16),
                               bias.reshape(1, -1)))
            self.params.append(layers)
            self.out_channels.append(chans[-1])
            self.mlp_widths.append(chans[1:])

    def _sample_points(self, points_xyz, features, indices, target_xyz):
        if indices is not None:
            new_xyz = _gather_along_points(points_xyz, indices)
        elif target_xyz is not None:
            new_xyz = target_xyz
        else:
            indices = _furthest_point_sample(points_xyz, self.num_point[0])
            new_xyz = _gather_along_points(points_xyz, indices)
        return new_xyz, indices

    def __call__(self, points_xyz, features=None, indices=None, target_xyz=None):
        new_xyz, indices = self._sample_points(points_xyz, features, indices, target_xyz)
        B, M, _ = new_xyz.shape
        N = points_xyz.shape[1]
        feats_nlc = None if features is None else jnp.transpose(features, (0, 2, 1))
        need_xyz = self.use_xyz or feats_nlc is None
        assert need_xyz or feats_nlc is not None

        # Lane-dense transposed point table for the ball query, padded with
        # far-away sentinel points so every (3, NT) chunk is dense (shared by
        # all scales).
        Np = _round_up(N, 128)
        if Np != N:
            pad = jnp.full((B, Np - N, 3), 1e6, points_xyz.dtype)
            pts_pad = jnp.concatenate([points_xyz, pad], axis=1)
        else:
            pts_pad = points_xyz
        points_t = jnp.transpose(pts_pad, (0, 2, 1))           # (B, 3, Np)

        # Gather table: xyz channels first (matches QueryAndGroup concat order).
        if need_xyz and feats_nlc is not None:
            tbl = jnp.concatenate([points_xyz, feats_nlc], axis=-1)
        elif need_xyz:
            tbl = points_xyz
        else:
            tbl = feats_nlc
        Cin = tbl.shape[-1]

        # Per-generation VMEM budget (v7x: 64 MiB, v5e/v6e: 128 MiB).
        cap = _vmem_capacity_bytes()
        vmem_limit = _vmem_limit_bytes(cap)
        budget = vmem_limit // 2

        new_features_list = []
        for i in range(len(self.radii)):
            K = self.sample_nums[i]
            radius = self.radii[i]

            # 1) Radius neighbourhood search (Pallas; N tiled with VMEM-carried
            #    per-query state).
            tm_bq, nt = _ball_query_tiles(M, Np, budget)
            idx_t = ball_query(new_xyz, points_t, radius, K,
                               tile_m=tm_bq, tile_n=nt, vmem_limit=vmem_limit)
            idx = jnp.transpose(idx_t, (0, 2, 1))              # (B, M, K)

            # 2) Gather + recenter + normalize + bf16 cast in the wrapper (XLA
            #    fuses the elementwise work into the gather).  xyz rides in the
            #    same lane-dense bf16 tensor as the features, so layer 0 of the
            #    MLP is one matmul against the full (Cin, C1) weight.
            # TODO(synk): fuse this gather into the MLP kernel (per-batch point
            # table resident in VMEM + in-kernel gather) to remove the remaining
            # (B, M*K, Cin) HBM round trip.
            g = _gather_along_points(tbl, idx)                 # (B, M, K, Cin) f32
            if need_xyz:
                off = new_xyz
                if Cin > 3:
                    off = jnp.concatenate(
                        [new_xyz, jnp.zeros((B, M, Cin - 3), new_xyz.dtype)], axis=-1)
                g = g - off[:, :, None, :]
                if self.normalize_xyz:
                    sc = jnp.concatenate(
                        [jnp.full((3,), 1.0 / float(radius), g.dtype),
                         jnp.ones((Cin - 3,), g.dtype)])
                    g = g * sc
            grouped = g.reshape(B, M * K, Cin).astype(jnp.bfloat16)

            # 3) Fused shared-MLP (bf16 MXU, folded BN) + pool over K (Pallas);
            #    writes (B, Cout, M) directly (lane-dense, no wrapper transpose).
            tm_mlp = _mlp_tile(M, K, Cin, self.mlp_widths[i], budget)
            pooled = mlp_pool(grouped, self.params[i], M=M, K=K,
                              pool_mod=self.pool_mod, tile_m=tm_mlp,
                              vmem_limit=vmem_limit)
            new_features_list.append(pooled)                   # (B, Cout_i, M)

        new_features = jnp.concatenate(new_features_list, axis=1)  # (B, sum Cout, M)
        return new_xyz, new_features, indices


# ----------------------------------------------------------------------------
# Demo
# ----------------------------------------------------------------------------
if __name__ == "__main__":
    key = jax.random.PRNGKey(0)
    k_params, k_xyz, k_feat = jax.random.split(key, 3)

    B, N, C = 2, 64, 4
    num_point = 16
    radii = [0.4, 0.8]
    sample_nums = [8, 16]
    mlp_channels = [[C, 16, 32], [C, 16, 64]]

    module = BasePointSAModulePallas(num_point, radii, sample_nums, mlp_channels,
                                     k_params, use_xyz=True, pool_mod="max")

    points_xyz = jax.random.uniform(k_xyz, (B, N, 3), jnp.float32)
    features = jax.random.normal(k_feat, (B, C, N), jnp.float32)

    new_xyz, new_features, indices = module(points_xyz, features)
    jax.block_until_ready((new_xyz, new_features, indices))

    assert new_xyz.shape == (B, num_point, 3)
    assert new_features.shape == (B, 32 + 64, num_point)
    assert indices.shape == (B, num_point)
    assert bool(jnp.all(jnp.isfinite(new_features)))
    print("KERNEL_OK")
</pallas_src>

<mosaic_0001>
module attributes {stable_mosaic.version = 11 : i64} {
  func.func @_ball_query_kernel(%arg0: i32, %arg1: i32, %arg2: i32, %arg3: memref<1x16x3xf32, #tpu.memory_space<vmem>>, %arg4: memref<1x3x128xf32, #tpu.memory_space<vmem>>, %arg5: memref<1x8x16xi32, #tpu.memory_space<vmem>>, %arg6: memref<16x1xf32, #tpu.memory_space<vmem>>, %arg7: memref<16x8xf32, #tpu.memory_space<vmem>>) attributes {dimension_semantics = [#tpu.dimension_semantics<parallel>, #tpu.dimension_semantics<parallel>, #tpu.dimension_semantics<arbitrary>], iteration_bounds = array<i64: 2, 1, 1>, scalar_prefetch = 0 : i64, scratch_operands = 2 : i64, tpu.core_type = #tpu.core_type<tc>, window_params = [{transform_indices = @transform_0, window_bounds = array<i64: 1, 16, 3>}, {transform_indices = @transform_1, window_bounds = array<i64: 1, 3, 128>}, {transform_indices = @transform_2, window_bounds = array<i64: 1, 8, 16>}]} {
    %c0_i32 = arith.constant 0 : i32
    %0 = arith.cmpi eq, %arg2, %c0_i32 : i32
    %1 = arith.extui %0 : i1 to i32
    %c0_i32_0 = arith.constant 0 : i32
    %2 = arith.cmpi ne, %1, %c0_i32_0 : i32
    scf.if %2 {
      %cst_55 = arith.constant 0.000000e+00 : f32
      %141 = vector.broadcast %cst_55 : f32 to vector<16x1xf32>
      %c0_56 = arith.constant 0 : index
      %c0_57 = arith.constant 0 : index
      %142 = vector.load %arg6[%c0_56, %c0_57] : memref<16x1xf32, #tpu.memory_space<vmem>>, vector<16x1xf32>
      tpu.vector_store %arg6[%c0_56, %c0_57], %141 {strides = array<i32>} : memref<16x1xf32, #tpu.memory_space<vmem>>, vector<16x1xf32>,
      %cst_58 = arith.constant 0.000000e+00 : f32
      %143 = vector.broadcast %cst_58 : f32 to vector<16x8xf32>
      %c0_59 = arith.constant 0 : index
      %c0_60 = arith.constant 0 : index
      %144 = vector.load %arg7[%c0_59, %c0_60] : memref<16x8xf32, #tpu.memory_space<vmem>>, vector<16x8xf32>
      tpu.vector_store %arg7[%c0_59, %c0_60], %143 {strides = array<i32>} : memref<16x8xf32, #tpu.memory_space<vmem>>, vector<16x8xf32>,
    } else {
    }
    %c0 = arith.constant 0 : index
    %c0_1 = arith.constant 0 : index
    %c0_2 = arith.constant 0 : index
    %3 = vector.load %arg3[%c0, %c0_1, %c0_2] : memref<1x16x3xf32, #tpu.memory_space<vmem>>, vector<1x16x3xf32>
    %4 = vector.shape_cast %3 : vector<1x16x3xf32> to vector<16x3xf32>
    %c0_3 = arith.constant 0 : index
    %c0_4 = arith.constant 0 : index
    %c0_5 = arith.constant 0 : index
    %5 = vector.load %arg4[%c0_3, %c0_4, %c0_5] : memref<1x3x128xf32, #tpu.memory_space<vmem>>, vector<1x3x128xf32>
    %6 = vector.shape_cast %5 : vector<1x3x128xf32> to vector<3x128xf32>
    %7 = vector.extract_strided_slice %4 {offsets = [0, 0], sizes = [16, 1], strides = [1, 1]} : vector<16x3xf32> to vector<16x1xf32>
    %8 = vector.extract_strided_slice %6 {offsets = [0, 0], sizes = [1, 128], strides = [1, 1]} : vector<3x128xf32> to vector<1x128xf32>
    %9 = vector.broadcast %7 : vector<16x1xf32> to vector<16x128xf32>
    %10 = vector.broadcast %8 : vector<1x128xf32> to vector<16x128xf32>
    %11 = arith.subf %9, %10 : vector<16x128xf32>
    %12 = vector.extract_strided_slice %4 {offsets = [0, 1], sizes = [16, 1], strides = [1, 1]} : vector<16x3xf32> to vector<16x1xf32>
    %13 = vector.extract_strided_slice %6 {offsets = [1, 0], sizes = [1, 128], strides = [1, 1]} : vector<3x128xf32> to vector<1x128xf32>
    %14 = vector.broadcast %12 : vector<16x1xf32> to vector<16x128xf32>
    %15 = vector.broadcast %13 : vector<1x128xf32> to vector<16x128xf32>
    %16 = arith.subf %14, %15 : vector<16x128xf32>
    %17 = vector.extract_strided_slice %4 {offsets = [0, 2], sizes = [16, 1], strides = [1, 1]} : vector<16x3xf32> to vector<16x1xf32>
    %18 = vector.extract_strided_slice %6 {offsets = [2, 0], sizes = [1, 128], strides = [1, 1]} : vector<3x128xf32> to vector<1x128xf32>
    %19 = vector.broadcast %17 : vector<16x1xf32> to vector<16x128xf32>
    %20 = vector.broadcast %18 : vector<1x128xf32> to vector<16x128xf32>
    %21 = arith.subf %19, %20 : vector<16x128xf32>
    %22 = arith.mulf %11, %11 : vector<16x128xf32>
    %23 = arith.mulf %16, %16 : vector<16x128xf32>
    %24 = arith.addf %22, %23 : vector<16x128xf32>
    %25 = arith.mulf %21, %21 : vector<16x128xf32>
    %26 = arith.addf %24, %25 : vector<16x128xf32>
    %cst = arith.constant 1.600000e-01 : f32
    %27 = vector.broadcast %cst : f32 to vector<16x128xf32>
    %28 = arith.cmpf olt, %26, %27 : vector<16x128xf32>
    %29 = arith.extui %28 : vector<16x128xi1> to vector<16x128xi32>
    %30 = arith.sitofp %29 : vector<16x128xi32> to vector<16x128xf32>
    %31 = tpu.iota {dimensions = array<i32: 1>} : vector<16x128xi32>
    %c128_i32 = arith.constant 128 : i32
    %32 = arith.muli %arg2, %c128_i32 : i32
    %33 = vector.broadcast %32 : i32 to vector<16x128xi32>
    %34 = arith.addi %31, %33 : vector<16x128xi32>
    %35 = arith.sitofp %34 : vector<16x128xi32> to vector<16x128xf32>
    %36 = arith.mulf %30, %35 : vector<16x128xf32>
    %c1_i32 = arith.constant 1 : i32
    %37 = tpu.dynamic_rotate %30 by %c1_i32 dim 1 : vector<16x128xf32>, i32 -> vector<16x128xf32>
    %c1_i32_6 = arith.constant 1 : i32
    %38 = vector.broadcast %c1_i32_6 : i32 to vector<16x128xi32>
    %39 = arith.cmpi sge, %31, %38 : vector<16x128xi32>
    %cst_7 = arith.constant 0.000000e+00 : f32
    %40 = vector.broadcast %cst_7 : f32 to vector<16x128xf32>
    %41 = arith.select %39, %37, %40 : vector<16x128xi1>, vector<16x128xf32>
    %42 = arith.addf %30, %41 : vector<16x128xf32>
    %c2_i32 = arith.constant 2 : i32
    %43 = tpu.dynamic_rotate %42 by %c2_i32 dim 1 : vector<16x128xf32>, i32 -> vector<16x128xf32>
    %c2_i32_8 = arith.constant 2 : i32
    %44 = vector.broadcast %c2_i32_8 : i32 to vector<16x128xi32>
    %45 = arith.cmpi sge, %31, %44 : vector<16x128xi32>
    %cst_9 = arith.constant 0.000000e+00 : f32
    %46 = vector.broadcast %cst_9 : f32 to vector<16x128xf32>
    %47 = arith.select %45, %43, %46 : vector<16x128xi1>, vector<16x128xf32>
    %48 = arith.addf %42, %47 : vector<16x128xf32>
    %c4_i32 = arith.constant 4 : i32
    %49 = tpu.dynamic_rotate %48 by %c4_i32 dim 1 : vector<16x128xf32>, i32 -> vector<16x128xf32>
    %c4_i32_10 = arith.constant 4 : i32
    %50 = vector.broadcast %c4_i32_10 : i32 to vector<16x128xi32>
    %51 = arith.cmpi sge, %31, %50 : vector<16x128xi32>
    %cst_11 = arith.constant 0.000000e+00 : f32
    %52 = vector.broadcast %cst_11 : f32 to vector<16x128xf32>
    %53 = arith.select %51, %49, %52 : vector<16x128xi1>, vector<16x128xf32>
    %54 = arith.addf %48, %53 : vector<16x128xf32>
    %c8_i32 = arith.constant 8 : i32
    %55 = tpu.dynamic_rotate %54 by %c8_i32 dim 1 : vector<16x128xf32>, i32 -> vector<16x128xf32>
    %c8_i32_12 = arith.constant 8 : i32
    %56 = vector.broadcast %c8_i32_12 : i32 to vector<16x128xi32>
    %57 = arith.cmpi sge, %31, %56 : vector<16x128xi32>
    %cst_13 = arith.constant 0.000000e+00 : f32
    %58 = vector.broadcast %cst_13 : f32 to vector<16x128xf32>
    %59 = arith.select %57, %55, %58 : vector<16x128xi1>, vector<16x128xf32>
    %60 = arith.addf %54, %59 : vector<16x128xf32>
    %c16_i32 = arith.constant 16 : i32
    %61 = tpu.dynamic_rotate %60 by %c16_i32 dim 1 : vector<16x128xf32>, i32 -> vector<16x128xf32>
    %c16_i32_14 = arith.constant 16 : i32
    %62 = vector.broadcast %c16_i32_14 : i32 to vector<16x128xi32>
    %63 = arith.cmpi sge, %31, %62 : vector<16x128xi32>
    %cst_15 = arith.constant 0.000000e+00 : f32
    %64 = vector.broadcast %cst_15 : f32 to vector<16x128xf32>
    %65 = arith.select %63, %61, %64 : vector<16x128xi1>, vector<16x128xf32>
    %66 = arith.addf %60, %65 : vector<16x128xf32>
    %c32_i32 = arith.constant 32 : i32
    %67 = tpu.dynamic_rotate %66 by %c32_i32 dim 1 : vector<16x128xf32>, i32 -> vector<16x128xf32>
    %c32_i32_16 = arith.constant 32 : i32
    %68 = vector.broadcast %c32_i32_16 : i32 to vector<16x128xi32>
    %69 = arith.cmpi sge, %31, %68 : vector<16x128xi32>
    %cst_17 = arith.constant 0.000000e+00 : f32
    %70 = vector.broadcast %cst_17 : f32 to vector<16x128xf32>
    %71 = arith.select %69, %67, %70 : vector<16x128xi1>, vector<16x128xf32>
    %72 = arith.addf %66, %71 : vector<16x128xf32>
    %c64_i32 = arith.constant 64 : i32
    %73 = tpu.dynamic_rotate %72 by %c64_i32 dim 1 : vector<16x128xf32>, i32 -> vector<16x128xf32>
    %c64_i32_18 = arith.constant 64 : i32
    %74 = vector.broadcast %c64_i32_18 : i32 to vector<16x128xi32>
    %75 = arith.cmpi sge, %31, %74 : vector<16x128xi32>
    %cst_19 = arith.constant 0.000000e+00 : f32
    %76 = vector.broadcast %cst_19 : f32 to vector<16x128xf32>
    %77 = arith.select %75, %73, %76 : vector<16x128xi1>, vector<16x128xf32>
    %78 = arith.addf %72, %77 : vector<16x128xf32>
    %c0_20 = arith.constant 0 : index
    %c0_21 = arith.constant 0 : index
    %79 = vector.load %arg6[%c0_20, %c0_21] : memref<16x1xf32, #tpu.memory_space<vmem>>, vector<16x1xf32>
    %80 = vector.broadcast %79 : vector<16x1xf32> to vector<16x128xf32>
    %81 = arith.addf %78, %80 : vector<16x128xf32>
    %cst_22 = arith.constant dense<0.000000e+00> : vector<16xf32>
    %82 = vector.multi_reduction <add>, %30, %cst_22 [1] : vector<16x128xf32> to vector<16xf32>
    %83 = vector.shape_cast %82 : vector<16xf32> to vector<16x1xf32>
    %84 = arith.addf %79, %83 : vector<16x1xf32>
    %c0_23 = arith.constant 0 : index
    %c0_24 = arith.constant 0 : index
    %85 = vector.load %arg6[%c0_23, %c0_24] : memref<16x1xf32, #tpu.memory_space<vmem>>, vector<16x1xf32>
    tpu.vector_store %arg6[%c0_23, %c0_24], %84 {strides = array<i32>} : memref<16x1xf32, #tpu.memory_space<vmem>>, vector<16x1xf32>,
    %cst_25 = arith.constant 1.000000e+00 : f32
    %86 = vector.broadcast %cst_25 : f32 to vector<16x128xf32>
    %87 = arith.cmpf oeq, %81, %86 : vector<16x128xf32>
    %cst_26 = arith.constant 0.000000e+00 : f32
    %88 = vector.broadcast %cst_26 : f32 to vector<16x128xf32>
    %89 = arith.select %87, %36, %88 : vector<16x128xi1>, vector<16x128xf32>
    %cst_27 = arith.constant dense<0.000000e+00> : vector<16xf32>
    %90 = vector.multi_reduction <add>, %89, %cst_27 [1] : vector<16x128xf32> to vector<16xf32>
    %91 = vector.shape_cast %90 : vector<16xf32> to vector<16x1xf32>
    %cst_28 = arith.constant 2.000000e+00 : f32
    %92 = vector.broadcast %cst_28 : f32 to vector<16x128xf32>
    %93 = arith.cmpf oeq, %81, %92 : vector<16x128xf32>
    %cst_29 = arith.constant 0.000000e+00 : f32
    %94 = vector.broadcast %cst_29 : f32 to vector<16x128xf32>
    %95 = arith.select %93, %36, %94 : vector<16x128xi1>, vector<16x128xf32>
    %cst_30 = arith.constant dense<0.000000e+00> : vector<16xf32>
    %96 = vector.multi_reduction <add>, %95, %cst_30 [1] : vector<16x128xf32> to vector<16xf32>
    %97 = vector.shape_cast %96 : vector<16xf32> to vector<16x1xf32>
    %cst_31 = arith.constant 3.000000e+00 : f32
    %98 = vector.broadcast %cst_31 : f32 to vector<16x128xf32>
    %99 = arith.cmpf oeq, %81, %98 : vector<16x128xf32>
    %cst_32 = arith.constant 0.000000e+00 : f32
    %100 = vector.broadcast %cst_32 : f32 to vector<16x128xf32>
    %101 = arith.select %99, %36, %100 : vector<16x128xi1>, vector<16x128xf32>
    %cst_33 = arith.constant dense<0.000000e+00> : vector<16xf32>
    %102 = vector.multi_reduction <add>, %101, %cst_33 [1] : vector<16x128xf32> to vector<16xf32>
    %103 = vector.shape_cast %102 : vector<16xf32> to vector<16x1xf32>
    %cst_34 = arith.constant 4.000000e+00 : f32
    %104 = vector.broadcast %cst_34 : f32 to vector<16x128xf32>
    %105 = arith.cmpf oeq, %81, %104 : vector<16x128xf32>
    %cst_35 = arith.constant 0.000000e+00 : f32
    %106 = vector.broadcast %cst_35 : f32 to vector<16x128xf32>
    %107 = arith.select %105, %36, %106 : vector<16x128xi1>, vector<16x128xf32>
    %cst_36 = arith.constant dense<0.000000e+00> : vector<16xf32>
    %108 = vector.multi_reduction <add>, %107, %cst_36 [1] : vector<16x128xf32> to vector<16xf32>
    %109 = vector.shape_cast %108 : vector<16xf32> to vector<16x1xf32>
    %cst_37 = arith.constant 5.000000e+00 : f32
    %110 = vector.broadcast %cst_37 : f32 to vector<16x128xf32>
    %111 = arith.cmpf oeq, %81, %110 : vector<16x128xf32>
    %cst_38 = arith.constant 0.000000e+00 : f32
    %112 = vector.broadcast %cst_38 : f32 to vector<16x128xf32>
    %113 = arith.select %111, %36, %112 : vector<16x128xi1>, vector<16x128xf32>
    %cst_39 = arith.constant dense<0.000000e+00> : vector<16xf32>
    %114 = vector.multi_reduction <add>, %113, %cst_39 [1] : vector<16x128xf32> to vector<16xf32>
    %115 = vector.shape_cast %114 : vector<16xf32> to vector<16x1xf32>
    %cst_40 = arith.constant 6.000000e+00 : f32
    %116 = vector.broadcast %cst_40 : f32 to vector<16x128xf32>
    %117 = arith.cmpf oeq, %81, %116 : vector<16x128xf32>
    %cst_41 = arith.constant 0.000000e+00 : f32
    %118 = vector.broadcast %cst_41 : f32 to vector<16x128xf32>
    %119 = arith.select %117, %36, %118 : vector<16x128xi1>, vector<16x128xf32>
    %cst_42 = arith.constant dense<0.000000e+00> : vector<16xf32>
    %120 = vector.multi_reduction <add>, %119, %cst_42 [1] : vector<16x128xf32> to vector<16xf32>
    %121 = vector.shape_cast %120 : vector<16xf32> to vector<16x1xf32>
    %cst_43 = arith.constant 7.000000e+00 : f32
    %122 = vector.broadcast %cst_43 : f32 to vector<16x128xf32>
    %123 = arith.cmpf oeq, %81, %122 : vector<16x128xf32>
    %cst_44 = arith.constant 0.000000e+00 : f32
    %124 = vector.broadcast %cst_44 : f32 to vector<16x128xf32>
    %125 = arith.select %123, %36, %124 : vector<16x128xi1>, vector<16x128xf32>
    %cst_45 = arith.constant dense<0.000000e+00> : vector<16xf32>
    %126 = vector.multi_reduction <add>, %125, %cst_45 [1] : vector<16x128xf32> to vector<16xf32>
    %127 = vector.shape_cast %126 : vector<16xf32> to vector<16x1xf32>
    %cst_46 = arith.constant 8.000000e+00 : f32
    %128 = vector.broadcast %cst_46 : f32 to vector<16x128xf32>
    %129 = arith.cmpf oeq, %81, %128 : vector<16x128xf32>
    %cst_47 = arith.constant 0.000000e+00 : f32
    %130 = vector.broadcast %cst_47 : f32 to vector<16x128xf32>
    %131 = arith.select %129, %36, %130 : vector<16x128xi1>, vector<16x128xf32>
    %cst_48 = arith.constant dense<0.000000e+00> : vector<16xf32>
    %132 = vector.multi_reduction <add>, %131, %cst_48 [1] : vector<16x128xf32> to vector<16xf32>
    %133 = vector.shape_cast %132 : vector<16xf32> to vector<16x1xf32>
    %c0_49 = arith.constant 0 : index
    %c0_50 = arith.constant 0 : index
    %134 = vector.load %arg7[%c0_49, %c0_50] : memref<16x8xf32, #tpu.memory_space<vmem>>, vector<16x8xf32>
    %135 = tpu.concatenate %91, %97, %103, %109, %115, %121, %127, %133 in 1 : vector<16x1xf32>, vector<16x1xf32>, vector<16x1xf32>, vector<16x1xf32>, vector<16x1xf32>, vector<16x1xf32>, vector<16x1xf32>, vector<16x1xf32> -> vector<16x8xf32>
    %136 = arith.addf %134, %135 : vector<16x8xf32>
    %c0_51 = arith.constant 0 : index
    %c0_52 = arith.constant 0 : index
    %137 = vector.load %arg7[%c0_51, %c0_52] : memref<16x8xf32, #tpu.memory_space<vmem>>, vector<16x8xf32>
    tpu.vector_store %arg7[%c0_51, %c0_52], %136 {strides = array<i32>} : memref<16x8xf32, #tpu.memory_space<vmem>>, vector<16x8xf32>,
    %c0_i32_53 = arith.constant 0 : i32
    %138 = arith.cmpi eq, %arg2, %c0_i32_53 : i32
    %139 = arith.extui %138 : i1 to i32
    %c0_i32_54 = arith.constant 0 : i32
    %140 = arith.cmpi ne, %139, %c0_i32_54 : i32
    scf.if %140 {
      %c0_55 = arith.constant 0 : index
      %c0_56 = arith.constant 0 : index
      %141 = vector.load %arg6[%c0_55, %c0_56] : memref<16x1xf32, #tpu.memory_space<vmem>>, vector<16x1xf32>
      %c0_57 = arith.constant 0 : index
      %c0_58 = arith.constant 0 : index
      %142 = vector.load %arg7[%c0_57, %c0_58] : memref<16x8xf32, #tpu.memory_space<vmem>>, vector<16x8xf32>
      %143 = vector.extract_strided_slice %142 {offsets = [0, 0], sizes = [16, 1], strides = [1, 1]} : vector<16x8xf32> to vector<16x1xf32>
      %144 = tpu.iota {dimensions = array<i32: 1>} : vector<16x8xi32>
      %145 = arith.sitofp %144 : vector<16x8xi32> to vector<16x8xf32>
      %cst_59 = arith.constant 5.000000e-01 : f32
      %146 = vector.broadcast %cst_59 : f32 to vector<16x8xf32>
      %147 = arith.addf %145, %146 : vector<16x8xf32>
      %148 = vector.broadcast %141 : vector<16x1xf32> to vector<16x8xf32>
      %149 = arith.cmpf ogt, %148, %147 : vector<16x8xf32>
      %150 = vector.shape_cast %143 : vector<16x1xf32> to vector<16x1xf32>
      %151 = vector.broadcast %150 : vector<16x1xf32> to vector<16x8xf32>
      %152 = arith.select %149, %142, %151 : vector<16x8xi1>, vector<16x8xf32>
      %153 = tpu.transpose %152, [1, 0] : vector<16x8xf32> -> vector<8x16xf32>
      %154 = arith.fptosi %153 : vector<8x16xf32> to vector<8x16xi32>
      %c0_60 = arith.constant 0 : index
      %c0_61 = arith.constant 0 : index
      %c0_62 = arith.constant 0 : index
      %155 = vector.load %arg5[%c0_60, %c0_61, %c0_62] : memref<1x8x16xi32, #tpu.memory_space<vmem>>, vector<1x8x16xi32>
      %156 = vector.shape_cast %155 : vector<1x8x16xi32> to vector<8x16xi32>
      %157 = vector.shape_cast %154 : vector<8x16xi32> to vector<1x8x16xi32>
      tpu.vector_store %arg5[%c0_60, %c0_61, %c0_62], %157 {strides = array<i32>} : memref<1x8x16xi32, #tpu.memory_space<vmem>>, vector<1x8x16xi32>,
    } else {
    }
    return
  }
  func.func @transform_0(%arg0: i32, %arg1: i32, %arg2: i32) -> (i32, i32, i32) {
    %c0_i32 = arith.constant 0 : i32
    %c0_i32_0 = arith.constant 0 : i32
    return %arg0, %arg1, %c0_i32 : i32, i32, i32
  }
  func.func @transform_1(%arg0: i32, %arg1: i32, %arg2: i32) -> (i32, i32, i32) {
    %c0_i32 = arith.constant 0 : i32
    %c0_i32_0 = arith.constant 0 : i32
    return %arg0, %c0_i32, %arg2 : i32, i32, i32
  }
  func.func @transform_2(%arg0: i32, %arg1: i32, %arg2: i32) -> (i32, i32, i32) {
    %c0_i32 = arith.constant 0 : i32
    %c0_i32_0 = arith.constant 0 : i32
    return %arg0, %c0_i32, %arg1 : i32, i32, i32
  }
}

</mosaic_0001>

<bundles_post_ra>
// kernel: tpu_custom_call.1
= control target key start
LH: loop header
LB: loop body
LE: loop exit
PB: predicated region body
PF: predicated region fallthrough
CT: control target
= control target key end

     0   :  { %7 = vsyncpa [#allocation5], 0  ;;  %s1017_s0 = inlined_call_operand.vmem [shape: f32[2,16,3], index: 0, kind: input, shape index: {}]   ;;  %s1018_s1 = inlined_call_operand.vmem [shape: f32[2,3,128], index: 1, kind: input, shape index: {}]   ;;  %s1019_s2 = inlined_call_operand.hbm [shape: s32[2,8,16], index: 2, kind: output, shape index: {}]  }
   0x1   :  { %9 = vsyncpa [#allocation5 + $0x1], 0  ;;  %s839_s9 = smov 0   ;;  %s841_s10 = smov 0  }
   0x2   :  { %s843_s11 = smov 0   ;;  %s845_s12 = smov 0  }
   0x3   :  { %s847_s13 = smov 0   ;;  %s849_s14 = smov 0  }
   0x4 LB: > { %s640_s15 = sadd.s32 4294967295, %s810_s14   ;;  %s641_s16 = sadd.s32 4294967294, %s810_s14   ;;  %s810_s14 = sphi %s849_s14, %s15_s14   ;;  %s806_s13 = sphi %s847_s13, %s1026_s13   ;;  %s802_s12 = sphi %s845_s12, %s1025_s12   ;;  %s798_s11 = sphi %s843_s11, %s1024_s11   ;;  %s794_s10 = sphi %s841_s10, %s1023_s10   ;;  %s790_s9 = sphi %s839_s9, %s1022_s9  }
   0x5   : > { %s34_s17 = sadd.s32 1, %s806_s13  ;;  %s99_s18 = sadd.s32 1, %s798_s11 }
   0x6   : > { %p36_p0 = scmp.ge.s32.totalorder %s34_s17, 2  ;;  %p109_p1 = scmp.ne.s32.totalorder %s798_s11, %s794_s10 }
   0x7   : > { %p110_p2 = scmp.eq.s32.totalorder %s640_s15, 1  ;;  %p115_p3 = scmp.ne.s32.totalorder %s794_s10, %s790_s9 }
   0x8   : > { %s1028_s17 = smov (%p36_p0, %s34_s17), 0  ;;  %p116_p5 = scmp.eq.s32.totalorder %s641_s16, 1 }
   0x9   : > { %p879_p4 = por %p110_p2, %p109_p1  ;;  %s94_s20 = ssub.s32 %s806_s13, %s1028_s17 }
   0xa   : > { %p644_p6 = scmp.ge.s32.totalorder %s810_s14, 1  ;;  %p97_p7 = scmp.eq.s32.totalorder %s94_s20, 0 }
   0xb   : > { %p886_p8 = por %p116_p5, %p115_p3  ;;  %p157_p9 = scmp.lt.s32.totalorder %s810_s14, 3 }
   0xc   : > { %s892_s22 = scalar_select %p97_p7, %s798_s11, %s99_s18  }
   0xd   : > { %p158_p10 = pnand %p644_p6, %p157_p9 }
   0xe   : > { %p191_p11 = scmp.lt.s32.totalorder (!%p158_p10), %s802_s12, 1  ;;  %v812_v0 = vmov (!%p158_p10), 0   ;;  %v813_v3 = vmov (!%p158_p10), 1   ;;  %v814_v4 = vmov (!%p158_p10), 2   ;;  %vm211_vm0 = vcmask (!%p158_p10), 7168   ;;  %s816_s4 = smov (!%p158_p10), 1  }
   0xf   : > { %161 = sbr.rel (%p158_p10) target bundleno = 1460 (0x5b4), region = 28  ;;  %726 = vset.pattern.permute.xlu1 (!%p158_p10), %v812_v0  ;;  %724 = vset.pattern.permute.xlu0 (!%p158_p10), %v812_v0  ;;  %v815_v5 = vmov (!%p158_p10), 0.0   ;;  %v230_v6 = vlaneseq (!%p158_p10)  ;;  %s817_s5 = smov (!%p158_p10), 2  }
  0x10   : > { %212 = vst.msk [vmem:[#allocation2] sm:$0xff] (!%p158_p10), %vm211_vm0, %v815_v5  ;;  %213 = vst.msk [vmem:[#allocation2 + $0x8] sm:$0xff] (!%p158_p10), %vm211_vm0, %v815_v5  ;;  %s818_s6 = smov (!%p158_p10), 4   ;;  %s819_s7 = smov (!%p158_p10), 8  }
  0x11   : > { %v231_v7 = vshrl.u32 (!%p158_p10), %v230_v6, 7  ;;  %v914_v39 = vand.u32 (!%p158_p10), 127, %v230_v6  ;;  %s820_s8 = smov (!%p158_p10), 16   ;;  %s821_s15 = smov (!%p158_p10), 32  }
  0x12   : > { %s822_s16 = smov (!%p158_p10), 64   ;;  %s187_s18 = sand.u32 (!%p158_p10), 1, %s794_s10  }
  0x13   : > { %v246_v8 = vsub.s32 (!%p158_p10), 1, %v231_v7  ;;  %v232_v9 = vsub.s32 (!%p158_p10), 0, %v231_v7  ;;  %v260_v15 = vsub.s32 (!%p158_p10), 2, %v231_v7  ;;  %vm292_vm3 = vcmp.ge.s32.totalorder (!%p158_p10), %v914_v39, 1  ;;  %s645_s20 = sshll.u32 (!%p158_p10), %s187_s18, 3  ;;  %s534_s29 = scalar_lea.sflag (!%p158_p10), [#allocation5], %s187_s18 }
  0x14   : > { %vm301_vm4 = vcmp.ge.s32.totalorder (!%p158_p10), %v914_v39, 2  ;;  %vm310_vm5 = vcmp.ge.s32.totalorder (!%p158_p10), %v914_v39, 4  ;;  %vm319_vm6 = vcmp.ge.s32.totalorder (!%p158_p10), %v914_v39, 8  ;;  %vm328_vm7 = vcmp.ge.s32.totalorder (!%p158_p10), %v914_v39, 16 }
  0x15   : > { %vm337_vm8 = vcmp.ge.s32.totalorder (!%p158_p10), %v914_v39, 32  ;;  %vm346_vm9 = vcmp.ge.s32.totalorder (!%p158_p10), %v914_v39, 64 }
  0x16   : > { %s192_s23 = scalar_select %p191_p11, %s802_s12, 1 }
  0x17   : > { %v923_v6 = vld [vmem:[#allocation2] sm:$0xff] }
  0x18   : > { %s655_s24 = sshll.u32 %s192_s23, 4  ;;  %s648_s28 = sshll.u32 %s192_s23, 2 }
  0x19   : > { %s198_s27 = scalar_lea.vmem %s1017_s0, %s655_s24  ;;  %s206_s3 = scalar_lea.vmem %s1018_s1, %s648_s28 }
  0x1a   : > { %v218_v1 = vld [vmem:[%s198_s27 + $0x8] sm:$0xff]  ;;  %v217_v2 = vld [vmem:[%s198_s27] sm:$0xff]  ;;  %s652_s23 = sshll.u32 %s802_s12, 7  ;;  %s189_s24 = scalar_lea.vmem [#allocation4], %s645_s20 }
  0x1b   : > { %227 = vperm.xlu1 %726, %v218_v1   ;;  %222 = vperm.xlu0 %724, %v217_v2   ;;  %v219_v10 = vld [vmem:[%s206_s3] sm:$0x7]  ;;  %s548_s25 = sshll.u32 %s189_s24, 4  ;;  %s970_s28 = scalar_lea.hbm %s1019_s2, %s652_s23  ;;  %s972_s25 = int_to_ptr.vmem [resolvable:$true] %s548_s25 }
  0x1c   : > { %v247_v13 = vrot.slane %v219_v10, %v246_v8  ;;  %v233_v14 = vrot.slane %v219_v10, %v232_v9  ;;  %v261_v22 = vrot.slane %v219_v10, %v260_v15  ;;  %v926_v8 = vld [vmem:[#allocation2 + $0x8] sm:$0xff]  ;;  %s732_s30 = scalar_lea.vmem %s972_s25, 128  ;;  %s823_s12 = smov [#allocation4]  }
  0x1d   : > { %p733_p12 = scmp.ne.s32.totalorder %s972_s25, %s732_s30  ;;  %s736_s3 = sshll.u32 %s823_s12, 4  ;;  %s737_s3 = int_to_ptr.vmem [resolvable:$false] %s736_s3 }
  0x1e   : > { %p739_p1 = scmp.lt.s32.totalorder %s972_s25, %s737_s3 }
  0x1f   : > { %727 = vset.pattern.permute.xlu1 %v813_v3  ;;  %725 = vset.pattern.permute.xlu0 %v813_v3  ;;  %p734_p13 = pnand %p733_p12, %p879_p4 }
  0x20   : > { %241 = vperm.xlu1 %727, %v218_v1   ;;  %237 = vperm.xlu0 %725, %v217_v2  }
  0x21   : > { %p735_p0 = pneg %p734_p13 }
  0x24   : > { %728 = vset.pattern.permute.xlu1 %v814_v4  ;;  %729 = vset.pattern.permute.xlu0 %v814_v4 }
  0x25   : > { %251 = vperm.xlu1 %728, %v217_v2   ;;  %255 = vperm.xlu0 %729, %v218_v1  }
  0x29   : > { %731 = vset.pattern.permute.xlu1 %v812_v0  ;;  %730 = vset.pattern.permute.xlu0 %v812_v0 }
  0x9a   : > { %v228_v11 = vpop.permute.xlu1 %227  ;;  %v223_v12 = vpop.permute.xlu0 %222 }
  0x9b   : > { %v235_v20 = vsub.f32 %v228_v11, %v233_v14  ;;  %v234_v21 = vsub.f32 %v223_v12, %v233_v14 }
  0x9d   : > { %v265_v27 = vmul.f32 %v235_v20, %v235_v20  ;;  %v264_v28 = vmul.f32 %v234_v21, %v234_v21 }
  0x9f   : > { %v242_v16 = vpop.permute.xlu1 %241  ;;  %v238_v17 = vpop.permute.xlu0 %237 }
  0xa0   : > { %v249_v18 = vsub.f32 %v242_v16, %v247_v13  ;;  %v248_v19 = vsub.f32 %v238_v17, %v247_v13 }
  0xa2   : > { %v267_v23 = vmul.f32 %v249_v18, %v249_v18  ;;  %v266_v24 = vmul.f32 %v248_v19, %v248_v19  ;;  %v933_v18 = vcvt.s32.f32 %v914_v39 }
  0xa4   : > { %v252_v25 = vpop.permute.xlu1 %251  ;;  %v256_v26 = vpop.permute.xlu0 %255  ;;  %v269_v31 = vadd.f32 %v267_v23, %v265_v27  ;;  %v268_v32 = vadd.f32 %v266_v24, %v264_v28 }
  0xa5   : > { %v262_v29 = vsub.f32 %v252_v25, %v261_v22  ;;  %v263_v30 = vsub.f32 %v256_v26, %v261_v22 }
  0xa7   : > { %v270_v33 = vmul.f32 %v262_v29, %v262_v29  ;;  %v271_v34 = vmul.f32 %v263_v30, %v263_v30 }
  0xa9   : > { %v272_v35 = vadd.f32 %v270_v33, %v268_v32  ;;  %v273_v36 = vadd.f32 %v271_v34, %v269_v31 }
  0xab   : > { %vm274_vm1 = vcmp.lt.f32.partialorder %v272_v35, 0.16  ;;  %vm275_vm2 = vcmp.lt.f32.partialorder %v273_v36, 0.16 }
  0xac   : > { %v907_v37 = vsel %vm274_vm1, 1.0, %v815_v5  ;;  %v911_v38 = vsel %vm275_vm2, 1.0, %v815_v5 }
  0xad   : > { %288 = vrot.lane.b32.xlu1 %v907_v37, %s816_s4  ;;  %v286_v23 = vmul.f32 %v907_v37, %v933_v18  ;;  %v287_v29 = vmul.f32 %v911_v38, %v933_v18 }
  0xb1   : > { %290 = vrot.lane.b32.xlu1 %v911_v38, %s816_s4  ;;  %s738_s4 = scalar_lea.vmem %s737_s3, 256 }
  0xb2   : > { %p740_p2 = scmp.lt.s32.totalorder %s738_s4, %s732_s30 }
  0xb4   : > { %p741_p3 = por %p740_p2, %p739_p1 }
  0xb6   : > { %p742_p5 = pnand %p741_p3, %p735_p0 }
 0x11f   : > { %v289_v40 = vpop.permute.xlu1 %288 }
 0x120   : > { %v293_v41 = vsel %vm292_vm3, %v289_v40, 0.0 }
 0x121   : > { %v295_v42 = vadd.f32 %v907_v37, %v293_v41 }
 0x123   : > { %297 = vrot.lane.b32.xlu0 %v295_v42, %s817_s5  ;;  %v291_v43 = vpop.permute.xlu1 %290 }
 0x124   : > { %v294_v44 = vsel %vm292_vm3, %v291_v43, 0.0 }
 0x125   : > { %v296_v45 = vadd.f32 %v911_v38, %v294_v44 }
 0x127   : > { %299 = vrot.lane.b32.xlu1 %v296_v45, %s817_s5 }
 0x195   : > { %v298_v46 = vpop.permute.xlu0 %297 }
 0x196   : > { %v302_v47 = vsel %vm301_vm4, %v298_v46, 0.0 }
 0x197   : > { %v304_v48 = vadd.f32 %v302_v47, %v295_v42 }
 0x199   : > { %v300_v49 = vpop.permute.xlu1 %299  ;;  %306 = vrot.lane.b32.xlu0 %v304_v48, %s818_s6 }
 0x19a   : > { %v303_v50 = vsel %vm301_vm4, %v300_v49, 0.0 }
 0x19b   : > { %v305_v51 = vadd.f32 %v303_v50, %v296_v45 }
 0x19d   : > { %308 = vrot.lane.b32.xlu1 %v305_v51, %s818_s6 }
 0x20b   : > { %v307_v52 = vpop.permute.xlu0 %306 }
 0x20c   : > { %v311_v53 = vsel %vm310_vm5, %v307_v52, 0.0 }
 0x20d   : > { %v313_v54 = vadd.f32 %v311_v53, %v304_v48 }
 0x20f   : > { %v309_v55 = vpop.permute.xlu1 %308  ;;  %315 = vrot.lane.b32.xlu0 %v313_v54, %s819_s7 }
 0x210   : > { %v312_v56 = vsel %vm310_vm5, %v309_v55, 0.0 }
 0x211   : > { %v314_v57 = vadd.f32 %v312_v56, %v305_v51 }
 0x213   : > { %317 = vrot.lane.b32.xlu1 %v314_v57, %s819_s7 }
 0x281   : > { %v316_v58 = vpop.permute.xlu0 %315 }
 0x282   : > { %v320_v59 = vsel %vm319_vm6, %v316_v58, 0.0 }
 0x283   : > { %v322_v60 = vadd.f32 %v320_v59, %v313_v54 }
 0x285   : > { %v318_v61 = vpop.permute.xlu1 %317  ;;  %324 = vrot.lane.b32.xlu0 %v322_v60, %s820_s8 }
 0x286   : > { %v321_v62 = vsel %vm319_vm6, %v318_v61, 0.0 }
 0x287   : > { %v323_v63 = vadd.f32 %v321_v62, %v314_v57 }
 0x289   : > { %326 = vrot.lane.b32.xlu1 %v323_v63, %s820_s8 }
 0x2f7   : > { %v325_v0 = vpop.permute.xlu0 %324 }
 0x2f8   : > { %v329_v1 = vsel %vm328_vm7, %v325_v0, 0.0 }
 0x2f9   : > { %v331_v2 = vadd.f32 %v329_v1, %v322_v60 }
 0x2fb   : > { %v327_v3 = vpop.permute.xlu1 %326  ;;  %333 = vrot.lane.b32.xlu0 %v331_v2, %s821_s15 }
 0x2fc   : > { %v330_v4 = vsel %vm328_vm7, %v327_v3, 0.0 }
 0x2fd   : > { %v332_v7 = vadd.f32 %v330_v4, %v323_v63 }
 0x2ff   : > { %335 = vrot.lane.b32.xlu1 %v332_v7, %s821_s15  ;;  %355 = vperm.xlu0 %730, %v923_v6  }
 0x303   : > { %360 = vperm.xlu1 %731, %v926_v8  }
 0x36d   : > { %v334_v9 = vpop.permute.xlu0 %333 }
 0x36e   : > { %v338_v10 = vsel %vm337_vm8, %v334_v9, 0.0 }
 0x36f   : > { %v340_v11 = vadd.f32 %v338_v10, %v331_v2 }
 0x371   : > { %v336_v12 = vpop.permute.xlu1 %335  ;;  %342 = vrot.lane.b32.xlu1 %v340_v11, %s822_s16 }
 0x372   : > { %v339_v13 = vsel %vm337_vm8, %v336_v12, 0.0 }
 0x373   : > { %v341_v14 = vadd.f32 %v339_v13, %v332_v7 }
 0x375   : > { %344 = vrot.lane.b32.xlu0 %v341_v14, %s822_s16 }
 0x37e   : > { %v356_v16 = vpop.permute.xlu0 %355 }
 0x382   : > { %v361_v15 = vpop.permute.xlu1 %360 }
 0x394   : > { %365 = vadd.xlane.f32.xlu0 %v907_v37 }
 0x3e3   : > { %v343_v17 = vpop.permute.xlu1 %342 }
 0x3e4   : > { %v347_v19 = vsel %vm346_vm9, %v343_v17, 0.0 }
 0x3e5   : > { %v349_v20 = vadd.f32 %v347_v19, %v340_v11 }
 0x3e7   : > { %v363_v21 = vadd.f32 %v356_v16, %v349_v20  ;;  %v345_v22 = vpop.permute.xlu0 %344 }
 0x3e8   : > { %v348_v24 = vsel %vm346_vm9, %v345_v22, 0.0 }
 0x3e9   : > { %v350_v25 = vadd.f32 %v348_v24, %v341_v14  ;;  %vm382_vm10 = vcmp.eq.f32.partialorder %v363_v21, 2.0  ;;  %vm374_vm11 = vcmp.eq.f32.partialorder %v363_v21, 1.0  ;;  %vm390_vm12 = vcmp.eq.f32.partialorder %v363_v21, 3.0 }
 0x3ea   : > { %v384_v26 = vsel %vm382_vm10, %v286_v23, 0.0  ;;  %v376_v27 = vsel %vm374_vm11, %v286_v23, 0.0  ;;  %v392_v30 = vsel %vm390_vm12, %v286_v23, 0.0  ;;  %vm398_vm15 = vcmp.eq.f32.partialorder %v363_v21, 4.0 }
 0x3eb   : > { %v364_v28 = vadd.f32 %v361_v15, %v350_v25  ;;  %386 = vadd.xlane.f32.xlu0 %v384_v26  ;;  %378 = vadd.xlane.f32.xlu1 %v376_v27  ;;  %v400_v33 = vsel %vm398_vm15, %v286_v23, 0.0  ;;  %vm406_vm2 = vcmp.eq.f32.partialorder %v363_v21, 5.0  ;;  %vm414_vm4 = vcmp.eq.f32.partialorder %v363_v21, 6.0 }
 0x3ec   : > { %v408_v35 = vsel %vm406_vm2, %v286_v23, 0.0  ;;  %v416_v37 = vsel %vm414_vm4, %v286_v23, 0.0  ;;  %vm422_vm6 = vcmp.eq.f32.partialorder %v363_v21, 7.0  ;;  %vm430_vm7 = vcmp.eq.f32.partialorder %v363_v21, 8.0 }
 0x3ed   : > { %vm375_vm13 = vcmp.eq.f32.partialorder %v364_v28, 1.0  ;;  %vm383_vm14 = vcmp.eq.f32.partialorder %v364_v28, 2.0  ;;  %vm391_vm1 = vcmp.eq.f32.partialorder %v364_v28, 3.0  ;;  %vm399_vm3 = vcmp.eq.f32.partialorder %v364_v28, 4.0 }
 0x3ee   : > { %v377_v31 = vsel %vm375_vm13, %v287_v29, 0.0  ;;  %v385_v32 = vsel %vm383_vm14, %v287_v29, 0.0  ;;  %v393_v34 = vsel %vm391_vm1, %v287_v29, 0.0  ;;  %v401_v36 = vsel %vm399_vm3, %v287_v29, 0.0 }
 0x3ef   : > { %394 = vadd.xlane.f32.xlu0 %v392_v30  ;;  %380 = vadd.xlane.f32.xlu1 %v377_v31  ;;  %vm407_vm5 = vcmp.eq.f32.partialorder %v364_v28, 5.0  ;;  %v424_v40 = vsel %vm422_vm6, %v286_v23, 0.0  ;;  %vm415_vm8 = vcmp.eq.f32.partialorder %v364_v28, 6.0  ;;  %v432_v41 = vsel %vm430_vm7, %v286_v23, 0.0 }
 0x3f0   : > { %v409_v39 = vsel %vm407_vm5, %v287_v29, 0.0  ;;  %v417_v42 = vsel %vm415_vm8, %v287_v29, 0.0  ;;  %vm423_vm9 = vcmp.eq.f32.partialorder %v364_v28, 7.0  ;;  %vm431_vm10 = vcmp.eq.f32.partialorder %v364_v28, 8.0 }
 0x3f1   : > { %v425_v43 = vsel %vm423_vm9, %v287_v29, 0.0  ;;  %v433_v44 = vsel %vm431_vm10, %v287_v29, 0.0  ;;  %vm214_vm11 = vcmask 64512   ;;  %vm442_vm12 = vcmask 15360  }
 0x3f2   : > { %215 = vst.msk [vmem:[#allocation3] sm:$0xff] %vm214_vm11, %v815_v5  ;;  %216 = vst.msk [vmem:[#allocation3 + $0x8] sm:$0xff] %vm214_vm11, %v815_v5  ;;  %vm445_vm13 = vcmask 23552   ;;  %vm448_vm14 = vcmask 31744   ;;  %vm451_vm15 = vcmask 39936   ;;  %vm454_vm1 = vcmask 48128  }
 0x3f3   : > { %388 = vadd.xlane.f32.xlu0 %v385_v32  ;;  %402 = vadd.xlane.f32.xlu1 %v400_v33  ;;  %vm457_vm2 = vcmask 56320   ;;  %v473_v23 = vadd.f32 0.5, %v933_v18  ;;  %vm531_vm4 = vcmask 130048  }
 0x3f7   : > { %396 = vadd.xlane.f32.xlu0 %v393_v34  ;;  %410 = vadd.xlane.f32.xlu1 %v408_v35 }
 0x3f9   : > { %v438_v63 = vld [vmem:[#allocation3] sm:$0xff]  ;;  %v439_v15 = vld [vmem:[#allocation3 + $0x8] sm:$0xff] }
 0x3fb   : > { %404 = vadd.xlane.f32.xlu0 %v401_v36  ;;  %418 = vadd.xlane.f32.xlu1 %v416_v37 }
 0x3ff   : > { %412 = vadd.xlane.f32.xlu0 %v409_v39  ;;  %426 = vadd.xlane.f32.xlu1 %v424_v40 }
 0x403   : > { %434 = vadd.xlane.f32.xlu0 %v432_v41  ;;  %420 = vadd.xlane.f32.xlu1 %v417_v42 }
 0x407   : > { %367 = vadd.xlane.f32.xlu0 %v911_v38  ;;  %428 = vadd.xlane.f32.xlu1 %v425_v43 }
 0x40b   : > { %436 = vadd.xlane.f32.xlu1 %v433_v44 }
 0x421   : > { %v366_v45 = vpop.xlane.xlu0 %365 }
 0x422   : > { %v369_v46 = vadd.f32 %v366_v45, %v923_v6 }
 0x424   : > { %372 = vst.msk [vmem:[#allocation2] sm:$0xff] %vm211_vm0, %v369_v46 }
 0x42b   : > { %v468_v47 = vld [vmem:[#allocation2] sm:$0xff] }
 0x42c   : > { %476 = vperm.xlu0 %730, %v468_v47  }
 0x478   : > { %v379_v48 = vpop.xlane.xlu1 %378  ;;  %v387_v38 = vpop.xlane.xlu0 %386 }
 0x479   : > { %v440_v5 = vsel %vm211_vm0, %v379_v48, %v387_v38 }
 0x47c   : > { %v381_v49 = vpop.xlane.xlu1 %380  ;;  %v395_v50 = vpop.xlane.xlu0 %394 }
 0x47d   : > { %v443_v57 = vsel %vm442_vm12, %v440_v5, %v395_v50 }
 0x480   : > { %v403_v51 = vpop.xlane.xlu1 %402  ;;  %v389_v52 = vpop.xlane.xlu0 %388 }
 0x481   : > { %v446_v60 = vsel %vm445_vm13, %v443_v57, %v403_v51  ;;  %v441_v6 = vsel %vm211_vm0, %v381_v49, %v389_v52 }
 0x484   : > { %v411_v53 = vpop.xlane.xlu1 %410  ;;  %v397_v54 = vpop.xlane.xlu0 %396 }
 0x485   : > { %v449_v61 = vsel %vm448_vm14, %v446_v60, %v411_v53  ;;  %v444_v7 = vsel %vm442_vm12, %v441_v6, %v397_v54 }
 0x488   : > { %v419_v55 = vpop.xlane.xlu1 %418  ;;  %v405_v56 = vpop.xlane.xlu0 %404 }
 0x489   : > { %v452_v62 = vsel %vm451_vm15, %v449_v61, %v419_v55  ;;  %v447_v11 = vsel %vm445_vm13, %v444_v7, %v405_v56 }
 0x48c   : > { %v427_v58 = vpop.xlane.xlu1 %426  ;;  %v413_v59 = vpop.xlane.xlu0 %412 }
 0x48d   : > { %v455_v0 = vsel %vm454_vm1, %v452_v62, %v427_v58  ;;  %v450_v13 = vsel %vm448_vm14, %v447_v11, %v413_v59 }
 0x490   : > { %v421_v1 = vpop.xlane.xlu1 %420  ;;  %v435_v2 = vpop.xlane.xlu0 %434 }
 0x491   : > { %v458_v3 = vsel %vm457_vm2, %v455_v0, %v435_v2  ;;  %v453_v14 = vsel %vm451_vm15, %v450_v13, %v421_v1 }
 0x492   : > { %v460_v4 = vadd.f32 %v458_v3, %v438_v63 }
 0x494   : > { %463 = vst.msk [vmem:[#allocation3] sm:$0xff] %vm214_vm11, %v460_v4  ;;  %v429_v9 = vpop.xlane.xlu1 %428  ;;  %v368_v10 = vpop.xlane.xlu0 %367 }
 0x495   : > { %v370_v12 = vadd.f32 %v368_v10, %v926_v8  ;;  %v456_v16 = vsel %vm454_vm1, %v453_v14, %v429_v9 }
 0x497   : > { %373 = vst.msk [vmem:[#allocation2 + $0x8] sm:$0xff] %vm211_vm0, %v370_v12 }
 0x498   : > { %v437_v17 = vpop.xlane.xlu1 %436 }
 0x499   : > { %v459_v19 = vsel %vm457_vm2, %v456_v16, %v437_v17 }
 0x49a   : > { %v461_v20 = vadd.f32 %v459_v19, %v439_v15 }
 0x49b   : > { %v470_v21 = vld [vmem:[#allocation3] sm:$0xff] }
 0x49c   : > { %464 = vst.msk [vmem:[#allocation3 + $0x8] sm:$0xff] %vm214_vm11, %v461_v20  ;;  %488 = vperm.xlu1 %731, %v470_v21  }
 0x49e   : > { %v469_v22 = vld [vmem:[#allocation2 + $0x8] sm:$0xff] }
 0x4a0   : > { %481 = vperm.xlu1 %731, %v469_v22  }
 0x4a3   : > { %v471_v8 = vld [vmem:[#allocation3 + $0x8] sm:$0xff] }
 0x4a4   : > { %493 = vperm.xlu0 %730, %v471_v8  }
 0x4ab   : > { %v477_v24 = vpop.permute.xlu0 %476 }
 0x4ac   : > { %vm484_vm0 = vcmp.gt.f32.partialorder %v477_v24, %v473_v23 }
 0x51b   : > { %v489_v25 = vpop.permute.xlu1 %488 }
 0x51c   : > { %v496_v26 = vsel %vm484_vm0, %v470_v21, %v489_v25 }
 0x51d   : > { %498 = vxpose.xlu1.b32.start [1/2] (short) (narrow) %v496_v26, 8 }
 0x51f   : > { %v482_v27 = vpop.permute.xlu1 %481 }
 0x520   : > { %vm485_vm3 = vcmp.gt.f32.partialorder %v482_v27, %v473_v23 }
 0x523   : > { %v494_v28 = vpop.permute.xlu0 %493 }
 0x524   : > { %v497_v29 = vsel %vm485_vm3, %v471_v8, %v494_v28 }
 0x525   : > { %499 = vxpose.xlu1.b32.end [2/2] (short) (narrow) %v497_v29, 8 }
 0x5a1   : > { %v514_v30 = vpop.trf.xlu1 }
 0x5a2   : > { %v656_v31 = vtrunc.f32 %v514_v30 }
 0x5a4   : > { %v657_v18 = vcvt.f32.s32 %v656_v31 }
 0x5a6   : > { %532 = vst.msk [vmem:[%s189_s24] sm:$0xff] %vm531_vm4, %v657_v18 }
 0x5a7   : > { %745 = shalt.err (!%p742_p5)
}
 0x5a8   : > { %s746_s5 = scalar_lea.hbm %s970_s28, 128  ;;  %s750_s8 = scalar_lea.hbm %s1019_s2, 256 }
 0x5a9   : > { %p747_p6 = scmp.ne.s32.totalorder %s970_s28, %s746_s5  ;;  %p751_p10 = scmp.lt.u32.totalorder %s970_s28, %s1019_s2 }
 0x5aa   : > { %p752_p11 = scmp.lt.u32.totalorder %s750_s8, %s746_s5  ;;  %p754_p13 = scmp.lt.u32.totalorder %s746_s5, %s970_s28 }
 0x5ab   : > { %p748_p7 = pnand %p747_p6, %p879_p4 }
 0x5ac   : > { %p753_p12 = por %p752_p11, %p751_p10 }
 0x5ad   : > { %p749_p9 = pneg %p748_p7 }
 0x5ae   : > { %p755_p0 = por %p754_p13, %p753_p12 }
 0x5b0   : > { %p756_p1 = pnand %p755_p0, %p749_p9 }
 0x5b2   : > { %759 = shalt.err (!%p756_p1)
}
 0x5b3   : > { %658 = dma.vmem_to_hbm [thread:$0]  (%p879_p4), %s972_s25, 128, %s970_s28, %s534_s29  }
 0x5b4 PF: > { %p664_p2 = scmp.ge.s32.totalorder %s810_s14, 2  ;;  %s560_s18 = sand.u32 1, %s790_s9  }
 0x5b5   : > { %s561_s20 = scalar_lea.sflag [#allocation5], %s560_s18 }
 0x5b6   : > { %p661_p3 = pnand %p664_p2, %p886_p8 }
 0x5b8   : > { %785 = dma.done.wait (!%p661_p3), %s561_s20, 128  }
 0x5b9   : > { %787 = vsyncadd (!%p661_p3), %s561_s20, 4294967168  ;;  %s15_s14 = sadd.s32 1, %s810_s14   ;;  %s1022_s9 = smov %s794_s10 }
 0x5ba   : > { %p12_p5 = scmp.ge.s32.totalorder %s15_s14, 4   ;;  %s1023_s10 = smov %s798_s11 }
 0x5bb   : > { %s1024_s11 = smov %s892_s22  ;;  %s1025_s12 = smov %s806_s13 }
 0x5bc   : > { %s1026_s13 = smov %s1028_s17  ;;  %14 = sbr.rel (!%p12_p5) target bundleno = 4 (0x4), region = 74 }
 0x5c3   :  { %566 = vsyncpa [#allocation5], 1 }
 0x5c4   :  { %568 = vsyncpa [#allocation5 + $0x1], 1 }

</bundles_post_ra>
